<compile_context>
chip_gen: v7x
topology: tpu7x:2x2x1
jax: 0.10.0
libtpu: 0.0.40
codegen_flags: <defaults>
</compile_context>

<pallas_src>
import functools

import jax
import jax.numpy as jnp
from jax.experimental import pallas as pl
from jax.experimental.pallas import tpu as pltpu

LN_EPS = 1e-5


def _round_up(v, m):
    return ((v + m - 1) // m) * m


def _vmem_capacity_bytes():
    # Per-TensorCore VMEM capacity: v5e/v6e 128 MiB, v7x 64 MiB.
    try:
        info = pltpu.get_tpu_info()
        cap = getattr(info, "vmem_capacity_bytes", None)
        if cap:
            return int(cap)
    except Exception:
        pass
    return 64 * 1024 * 1024  # conservative (v7x) fallback


def res_dnn_kernel(x_ref, w_ref, b_ref, g_ref, bt_ref, o_ref, *, num_dnn,
                   matmul_dtype):
    # x_ref  : (TM, H)       activation tile
    # w_ref  : (L, H, H)     pre-transposed linear weights (x @ W), matmul_dtype
    # b_ref  : (L, H)        linear biases (f32)
    # g_ref  : (L + 1, H)    LayerNorm gammas (last row = final LayerNorm)
    # bt_ref : (L + 1, H)    LayerNorm betas
    # o_ref  : (TM, H)       output tile
    h_dim = x_ref.shape[-1]

    # Constant (H, H) matrix of 1/H.  dot(v, ones_over_h) gives the per-row
    # mean already broadcast across all H lanes, so both the cross-lane
    # reduction and the lane-broadcast run on the MXU instead of the XLU
    # (the saturated unit at small H).
    ones_over_h = jnp.full((h_dim, h_dim), 1.0 / h_dim, dtype=jnp.float32)

    def layernorm(v, gamma, beta):
        # Two-pass (centered) LayerNorm, reductions on the MXU, math in f32.
        mean_b = jnp.dot(v, ones_over_h, preferred_element_type=jnp.float32)
        c = v - mean_b
        var_b = jnp.dot(c * c, ones_over_h, preferred_element_type=jnp.float32)
        inv = jax.lax.rsqrt(var_b + LN_EPS)
        return c * inv * gamma + beta

    h = x_ref[...].astype(jnp.float32)

    # Static unroll: num_dnn is small (2 in the reference config).
    # TODO(synk): switch to lax.fori_loop with dynamic w_ref[l] indexing if
    # num_dnn grows beyond ~4 (bounds vreg live ranges / code size).
    for l in range(num_dnn):
        acc = jnp.dot(h.astype(matmul_dtype), w_ref[l],
                      preferred_element_type=jnp.float32)
        h = jnp.tanh(acc + b_ref[l, :])      # dropout = identity in eval mode
        h = layernorm(h, g_ref[l, :], bt_ref[l, :])

    # Residual: re-read the shortcut from the resident VMEM x tile instead of
    # keeping it live in vregs across the unrolled layer loop.
    h = jnp.tanh(x_ref[...].astype(jnp.float32) + h)
    h = layernorm(h, g_ref[num_dnn, :], bt_ref[num_dnn, :])

    o_ref[...] = h.astype(o_ref.dtype)


def res_dnn_layer(x, weights, biases, gammas, betas, *, tile_m=None,
                  matmul_dtype=None):
    """Pallas forward of Res_DNN_layer.

    x:             (N, H) activations.
    weights:       (L, H, H), pre-transposed so the kernel computes x @ W[l].
    biases:        (L, H).
    gammas/betas:  (L + 1, H); row L is the final (post-residual) LayerNorm.
    matmul_dtype:  dtype fed to the MXU for the layer matmuls (default bf16
                   when x is f32).  Accumulation / tanh / LayerNorm stay f32.
    """
    n, h = x.shape
    num_dnn = int(weights.shape[0])

    if matmul_dtype is None:
        matmul_dtype = jnp.bfloat16 if x.dtype == jnp.float32 else x.dtype
    matmul_dtype = jnp.dtype(matmul_dtype)

    weights = weights.astype(matmul_dtype)          # cast once in the wrapper
    biases = biases.astype(jnp.float32)
    gammas = gammas.astype(jnp.float32)
    betas = betas.astype(jnp.float32)

    x_item = jnp.dtype(x.dtype).itemsize
    w_item = matmul_dtype.itemsize

    # Resident (single-buffered) parameter footprint in VMEM.
    param_bytes = (num_dnn * h * h * w_item
                   + (num_dnn * h + 2 * (num_dnn + 1) * h) * 4)

    vmem_cap = int(0.75 * _vmem_capacity_bytes())   # headroom for Mosaic scratch

    if tile_m is None:
        # x tile + out tile, each double-buffered by the pipeline.
        per_row = 2 * 2 * h * x_item
        avail = max(vmem_cap - param_bytes - (8 << 20), per_row * 8)
        tile_m = int(min(2048, avail // per_row))   # big tiles amortize the
        tile_m = max(8, (tile_m // 8) * 8)          # ~0.35us per-step overhead
        # v7x megacore: the single "parallel" grid axis shards work across the
        # 2 TensorCores, so keep at least 2 grid steps whenever N allows.
        if n > 8:
            tile_m = min(tile_m, _round_up(pl.cdiv(n, 2), 8))
        tile_m = min(tile_m, _round_up(n, 8))       # don't exceed the batch
    if tile_m % 8 != 0:
        raise ValueError("tile_m must be a multiple of 8 (f32 sublane tiling)")

    # No jnp.pad copy: the grid over-runs N and Pallas masks the ragged last
    # block.  Garbage tail rows only affect their own (dropped) output rows
    # because every op here is row-wise (matmul rows, tanh, LayerNorm).
    grid = (pl.cdiv(n, tile_m),)

    act_bytes = 2 * 2 * tile_m * h * x_item
    vmem_needed = param_bytes + act_bytes + (8 << 20)
    if vmem_needed > vmem_cap:
        # TODO(synk): add a weight-streaming fallback (extra "arbitrary" grid
        # axis over layers) for H too large for all-layers-resident weights.
        raise ValueError(
            f"parameters + activation tiles ({vmem_needed} B) exceed the VMEM "
            f"budget ({vmem_cap} B); reduce hidden size or tile_m")
    vmem_limit = int(min(max(vmem_needed, 32 << 20), vmem_cap))

    cost = pl.CostEstimate(
        # layer matmuls + 2 LN stat dots per LayerNorm pass + elementwise
        flops=int(2 * n * h * h * (num_dnn + 2 * (num_dnn + 1))
                  + 10 * n * h * (num_dnn + 1)),
        transcendentals=int(2 * (num_dnn + 1) * n * h),   # tanh + rsqrt
        bytes_accessed=int(2 * n * h * x_item + param_bytes),
    )

    kernel = functools.partial(res_dnn_kernel, num_dnn=num_dnn,
                               matmul_dtype=matmul_dtype)

    return pl.pallas_call(
        kernel,
        out_shape=jax.ShapeDtypeStruct((n, h), x.dtype),
        grid_spec=pltpu.PrefetchScalarGridSpec(
            num_scalar_prefetch=0,
            grid=grid,
            in_specs=[
                pl.BlockSpec((tile_m, h), lambda i: (i, 0)),          # x tile
                # Grid-invariant operands: resident, single-buffered.
                pl.BlockSpec((num_dnn, h, h), lambda i: (0, 0, 0),
                             pipeline_mode=pl.Buffered(1)),           # weights
                pl.BlockSpec((num_dnn, h), lambda i: (0, 0),
                             pipeline_mode=pl.Buffered(1)),           # biases
                pl.BlockSpec((num_dnn + 1, h), lambda i: (0, 0),
                             pipeline_mode=pl.Buffered(1)),           # gammas
                pl.BlockSpec((num_dnn + 1, h), lambda i: (0, 0),
                             pipeline_mode=pl.Buffered(1)),           # betas
            ],
            out_specs=pl.BlockSpec((tile_m, h), lambda i: (i, 0)),
        ),
        compiler_params=pltpu.CompilerParams(
            dimension_semantics=("parallel",),
            vmem_limit_bytes=vmem_limit,
        ),
        cost_estimate=cost,
    )(x, weights, biases, gammas, betas)


def reference_jax(x, weights, biases, gammas, betas):
    # Pure-JAX reference (two-pass LayerNorm via jnp.mean, plain matmuls).
    def ln(v, g, b):
        mean = jnp.mean(v, axis=-1, keepdims=True)
        c = v - mean
        var = jnp.mean(c * c, axis=-1, keepdims=True)
        return c * jax.lax.rsqrt(var + LN_EPS) * g + b

    num_dnn = weights.shape[0]
    shortcut = x
    h = x
    for l in range(num_dnn):
        h = jnp.tanh(h @ weights[l] + biases[l])
        h = ln(h, gammas[l], betas[l])
    h = jnp.tanh(shortcut + h)
    return ln(h, gammas[num_dnn], betas[num_dnn])


if __name__ == "__main__":
    hidden_size = 128
    num_dnn = 2

    key = jax.random.PRNGKey(0)
    kx, kw, kb, kg, kbt, kx2 = jax.random.split(key, 6)

    # nn.Linear(hidden, hidden) init: uniform(-1/sqrt(H), 1/sqrt(H)).
    # Stored pre-transposed: (L, H_in, H_out) so the kernel computes x @ W.
    bound = 1.0 / (hidden_size ** 0.5)
    weights = jax.random.uniform(
        kw, (num_dnn, hidden_size, hidden_size), jnp.float32, -bound, bound)
    biases = jax.random.uniform(
        kb, (num_dnn, hidden_size), jnp.float32, -bound, bound)

    # LayerNorm params: PyTorch inits gamma=1, beta=0; perturb deterministically
    # so the affine transform is actually exercised.
    gammas = 1.0 + 0.1 * jax.random.normal(
        kg, (num_dnn + 1, hidden_size), dtype=jnp.float32)
    betas = 0.1 * jax.random.normal(
        kbt, (num_dnn + 1, hidden_size), dtype=jnp.float32)

    # --- small batch, f32 MXU operands, auto tile_m (>= 2 grid steps) ---
    batch = 16
    x = jax.random.normal(kx, (batch, hidden_size), dtype=jnp.float32)
    out = jax.block_until_ready(
        res_dnn_layer(x, weights, biases, gammas, betas,
                      matmul_dtype=jnp.float32))
    ref = reference_jax(x, weights, biases, gammas, betas)
    assert out.shape == (batch, hidden_size)
    # Tolerance leaves margin for the MXU's f32 operand handling in the
    # LayerNorm stat dots; structural bugs would be O(0.1+) on unit-scale LN
    # outputs and are still caught.
    assert jnp.allclose(out, ref, atol=2e-3, rtol=2e-3), "f32 mismatch"

    # --- batch not divisible by tile_m: exercises the ragged last block ---
    batch2 = 200
    x2 = jax.random.normal(kx2, (batch2, hidden_size), dtype=jnp.float32)
    out2 = jax.block_until_ready(
        res_dnn_layer(x2, weights, biases, gammas, betas, tile_m=64,
                      matmul_dtype=jnp.float32))
    ref2 = reference_jax(x2, weights, biases, gammas, betas)
    assert out2.shape == (batch2, hidden_size)
    assert jnp.allclose(out2, ref2, atol=2e-3, rtol=2e-3), "ragged mismatch"

    # --- default path: bf16 MXU operands, f32 accumulation / tanh / LN ---
    out_bf16 = jax.block_until_ready(
        res_dnn_layer(x2, weights, biases, gammas, betas))
    assert out_bf16.shape == (batch2, hidden_size)
    assert jnp.allclose(out_bf16, ref2, atol=5e-2, rtol=5e-2), "bf16 mismatch"

    print("KERNEL_OK")
</pallas_src>

<mosaic_0001>
module attributes {stable_mosaic.version = 11 : i64} {
  func.func @res_dnn_kernel(%arg0: i32, %arg1: memref<8x128xf32, #tpu.memory_space<vmem>>, %arg2: memref<2x128x128xf32, #tpu.memory_space<vmem>>, %arg3: memref<2x128xf32, #tpu.memory_space<vmem>>, %arg4: memref<3x128xf32, #tpu.memory_space<vmem>>, %arg5: memref<3x128xf32, #tpu.memory_space<vmem>>, %arg6: memref<8x128xf32, #tpu.memory_space<vmem>>) attributes {dimension_semantics = [#tpu.dimension_semantics<parallel>], iteration_bounds = array<i64: 2>, scalar_prefetch = 0 : i64, scratch_operands = 0 : i64, tpu.core_type = #tpu.core_type<tc>, window_params = [{transform_indices = @transform_0, window_bounds = array<i64: 8, 128>}, {pipeline_mode = #tpu.pipeline_mode<synchronous>, transform_indices = @transform_1, window_bounds = array<i64: 2, 128, 128>}, {pipeline_mode = #tpu.pipeline_mode<synchronous>, transform_indices = @transform_2, window_bounds = array<i64: 2, 128>}, {pipeline_mode = #tpu.pipeline_mode<synchronous>, transform_indices = @transform_3, window_bounds = array<i64: 3, 128>}, {pipeline_mode = #tpu.pipeline_mode<synchronous>, transform_indices = @transform_4, window_bounds = array<i64: 3, 128>}, {transform_indices = @transform_5, window_bounds = array<i64: 8, 128>}]} {
    %cst = arith.constant 7.812500e-03 : f32
    %0 = vector.broadcast %cst : f32 to vector<128x128xf32>
    %c0 = arith.constant 0 : index
    %c0_0 = arith.constant 0 : index
    %1 = vector.load %arg1[%c0, %c0_0] : memref<8x128xf32, #tpu.memory_space<vmem>>, vector<8x128xf32>
    %c0_1 = arith.constant 0 : index
    %c0_2 = arith.constant 0 : index
    %c0_3 = arith.constant 0 : index
    %2 = vector.load %arg2[%c0_1, %c0_2, %c0_3] : memref<2x128x128xf32, #tpu.memory_space<vmem>>, vector<1x128x128xf32>
    %3 = vector.shape_cast %2 : vector<1x128x128xf32> to vector<128x128xf32>
    %cst_4 = arith.constant dense<0.000000e+00> : vector<8x128xf32>
    %4 = tpu.matmul %1, %3, %cst_4 {dimension_numbers = #tpu.dot_dimension_numbers<[1], [0], [0], [1], [0, 0, 1, 1], [], []>} : vector<8x128xf32>, vector<128x128xf32>, vector<8x128xf32> -> vector<8x128xf32>
    %c0_5 = arith.constant 0 : index
    %c0_6 = arith.constant 0 : index
    %5 = vector.load %arg3[%c0_5, %c0_6] : memref<2x128xf32, #tpu.memory_space<vmem>>, vector<1x128xf32>
    %6 = vector.shape_cast %5 : vector<1x128xf32> to vector<128xf32>
    %7 = vector.shape_cast %6 : vector<128xf32> to vector<1x128xf32>
    %8 = vector.broadcast %7 : vector<1x128xf32> to vector<8x128xf32>
    %9 = arith.addf %4, %8 : vector<8x128xf32>
    %10 = math.tanh %9 : vector<8x128xf32>
    %c0_7 = arith.constant 0 : index
    %c0_8 = arith.constant 0 : index
    %11 = vector.load %arg4[%c0_7, %c0_8] : memref<3x128xf32, #tpu.memory_space<vmem>>, vector<1x128xf32>
    %12 = vector.shape_cast %11 : vector<1x128xf32> to vector<128xf32>
    %c0_9 = arith.constant 0 : index
    %c0_10 = arith.constant 0 : index
    %13 = vector.load %arg5[%c0_9, %c0_10] : memref<3x128xf32, #tpu.memory_space<vmem>>, vector<1x128xf32>
    %14 = vector.shape_cast %13 : vector<1x128xf32> to vector<128xf32>
    %cst_11 = arith.constant dense<0.000000e+00> : vector<8x128xf32>
    %15 = tpu.matmul %10, %0, %cst_11 {dimension_numbers = #tpu.dot_dimension_numbers<[1], [0], [0], [1], [0, 0, 1, 1], [], []>} : vector<8x128xf32>, vector<128x128xf32>, vector<8x128xf32> -> vector<8x128xf32>
    %16 = arith.subf %10, %15 : vector<8x128xf32>
    %17 = arith.mulf %16, %16 : vector<8x128xf32>
    %cst_12 = arith.constant dense<0.000000e+00> : vector<8x128xf32>
    %18 = tpu.matmul %17, %0, %cst_12 {dimension_numbers = #tpu.dot_dimension_numbers<[1], [0], [0], [1], [0, 0, 1, 1], [], []>} : vector<8x128xf32>, vector<128x128xf32>, vector<8x128xf32> -> vector<8x128xf32>
    %cst_13 = arith.constant 9.99999974E-6 : f32
    %19 = vector.broadcast %cst_13 : f32 to vector<8x128xf32>
    %20 = arith.addf %18, %19 : vector<8x128xf32>
    %21 = math.rsqrt %20 : vector<8x128xf32>
    %22 = arith.mulf %16, %21 : vector<8x128xf32>
    %23 = vector.shape_cast %12 : vector<128xf32> to vector<1x128xf32>
    %24 = vector.broadcast %23 : vector<1x128xf32> to vector<8x128xf32>
    %25 = arith.mulf %22, %24 : vector<8x128xf32>
    %26 = vector.shape_cast %14 : vector<128xf32> to vector<1x128xf32>
    %27 = vector.broadcast %26 : vector<1x128xf32> to vector<8x128xf32>
    %28 = arith.addf %25, %27 : vector<8x128xf32>
    %c1 = arith.constant 1 : index
    %c0_14 = arith.constant 0 : index
    %c0_15 = arith.constant 0 : index
    %29 = vector.load %arg2[%c1, %c0_14, %c0_15] : memref<2x128x128xf32, #tpu.memory_space<vmem>>, vector<1x128x128xf32>
    %30 = vector.shape_cast %29 : vector<1x128x128xf32> to vector<128x128xf32>
    %cst_16 = arith.constant dense<0.000000e+00> : vector<8x128xf32>
    %31 = tpu.matmul %28, %30, %cst_16 {dimension_numbers = #tpu.dot_dimension_numbers<[1], [0], [0], [1], [0, 0, 1, 1], [], []>} : vector<8x128xf32>, vector<128x128xf32>, vector<8x128xf32> -> vector<8x128xf32>
    %c1_17 = arith.constant 1 : index
    %c0_18 = arith.constant 0 : index
    %32 = vector.load %arg3[%c1_17, %c0_18] : memref<2x128xf32, #tpu.memory_space<vmem>>, vector<1x128xf32>
    %33 = vector.shape_cast %32 : vector<1x128xf32> to vector<128xf32>
    %34 = vector.shape_cast %33 : vector<128xf32> to vector<1x128xf32>
    %35 = vector.broadcast %34 : vector<1x128xf32> to vector<8x128xf32>
    %36 = arith.addf %31, %35 : vector<8x128xf32>
    %37 = math.tanh %36 : vector<8x128xf32>
    %c1_19 = arith.constant 1 : index
    %c0_20 = arith.constant 0 : index
    %38 = vector.load %arg4[%c1_19, %c0_20] : memref<3x128xf32, #tpu.memory_space<vmem>>, vector<1x128xf32>
    %39 = vector.shape_cast %38 : vector<1x128xf32> to vector<128xf32>
    %c1_21 = arith.constant 1 : index
    %c0_22 = arith.constant 0 : index
    %40 = vector.load %arg5[%c1_21, %c0_22] : memref<3x128xf32, #tpu.memory_space<vmem>>, vector<1x128xf32>
    %41 = vector.shape_cast %40 : vector<1x128xf32> to vector<128xf32>
    %cst_23 = arith.constant dense<0.000000e+00> : vector<8x128xf32>
    %42 = tpu.matmul %37, %0, %cst_23 {dimension_numbers = #tpu.dot_dimension_numbers<[1], [0], [0], [1], [0, 0, 1, 1], [], []>} : vector<8x128xf32>, vector<128x128xf32>, vector<8x128xf32> -> vector<8x128xf32>
    %43 = arith.subf %37, %42 : vector<8x128xf32>
    %44 = arith.mulf %43, %43 : vector<8x128xf32>
    %cst_24 = arith.constant dense<0.000000e+00> : vector<8x128xf32>
    %45 = tpu.matmul %44, %0, %cst_24 {dimension_numbers = #tpu.dot_dimension_numbers<[1], [0], [0], [1], [0, 0, 1, 1], [], []>} : vector<8x128xf32>, vector<128x128xf32>, vector<8x128xf32> -> vector<8x128xf32>
    %cst_25 = arith.constant 9.99999974E-6 : f32
    %46 = vector.broadcast %cst_25 : f32 to vector<8x128xf32>
    %47 = arith.addf %45, %46 : vector<8x128xf32>
    %48 = math.rsqrt %47 : vector<8x128xf32>
    %49 = arith.mulf %43, %48 : vector<8x128xf32>
    %50 = vector.shape_cast %39 : vector<128xf32> to vector<1x128xf32>
    %51 = vector.broadcast %50 : vector<1x128xf32> to vector<8x128xf32>
    %52 = arith.mulf %49, %51 : vector<8x128xf32>
    %53 = vector.shape_cast %41 : vector<128xf32> to vector<1x128xf32>
    %54 = vector.broadcast %53 : vector<1x128xf32> to vector<8x128xf32>
    %55 = arith.addf %52, %54 : vector<8x128xf32>
    %c0_26 = arith.constant 0 : index
    %c0_27 = arith.constant 0 : index
    %56 = vector.load %arg1[%c0_26, %c0_27] : memref<8x128xf32, #tpu.memory_space<vmem>>, vector<8x128xf32>
    %57 = arith.addf %56, %55 : vector<8x128xf32>
    %58 = math.tanh %57 : vector<8x128xf32>
    %c2 = arith.constant 2 : index
    %c0_28 = arith.constant 0 : index
    %59 = vector.load %arg4[%c2, %c0_28] : memref<3x128xf32, #tpu.memory_space<vmem>>, vector<1x128xf32>
    %60 = vector.shape_cast %59 : vector<1x128xf32> to vector<128xf32>
    %c2_29 = arith.constant 2 : index
    %c0_30 = arith.constant 0 : index
    %61 = vector.load %arg5[%c2_29, %c0_30] : memref<3x128xf32, #tpu.memory_space<vmem>>, vector<1x128xf32>
    %62 = vector.shape_cast %61 : vector<1x128xf32> to vector<128xf32>
    %cst_31 = arith.constant dense<0.000000e+00> : vector<8x128xf32>
    %63 = tpu.matmul %58, %0, %cst_31 {dimension_numbers = #tpu.dot_dimension_numbers<[1], [0], [0], [1], [0, 0, 1, 1], [], []>} : vector<8x128xf32>, vector<128x128xf32>, vector<8x128xf32> -> vector<8x128xf32>
    %64 = arith.subf %58, %63 : vector<8x128xf32>
    %65 = arith.mulf %64, %64 : vector<8x128xf32>
    %cst_32 = arith.constant dense<0.000000e+00> : vector<8x128xf32>
    %66 = tpu.matmul %65, %0, %cst_32 {dimension_numbers = #tpu.dot_dimension_numbers<[1], [0], [0], [1], [0, 0, 1, 1], [], []>} : vector<8x128xf32>, vector<128x128xf32>, vector<8x128xf32> -> vector<8x128xf32>
    %cst_33 = arith.constant 9.99999974E-6 : f32
    %67 = vector.broadcast %cst_33 : f32 to vector<8x128xf32>
    %68 = arith.addf %66, %67 : vector<8x128xf32>
    %69 = math.rsqrt %68 : vector<8x128xf32>
    %70 = arith.mulf %64, %69 : vector<8x128xf32>
    %71 = vector.shape_cast %60 : vector<128xf32> to vector<1x128xf32>
    %72 = vector.broadcast %71 : vector<1x128xf32> to vector<8x128xf32>
    %73 = arith.mulf %70, %72 : vector<8x128xf32>
    %74 = vector.shape_cast %62 : vector<128xf32> to vector<1x128xf32>
    %75 = vector.broadcast %74 : vector<1x128xf32> to vector<8x128xf32>
    %76 = arith.addf %73, %75 : vector<8x128xf32>
    %c0_34 = arith.constant 0 : index
    %c0_35 = arith.constant 0 : index
    %77 = vector.load %arg6[%c0_34, %c0_35] : memref<8x128xf32, #tpu.memory_space<vmem>>, vector<8x128xf32>
    tpu.vector_store %arg6[%c0_34, %c0_35], %76 {strides = array<i32>} : memref<8x128xf32, #tpu.memory_space<vmem>>, vector<8x128xf32>,
    return
  }
  func.func @transform_0(%arg0: i32) -> (i32, i32) {
    %c0_i32 = arith.constant 0 : i32
    %c0_i32_0 = arith.constant 0 : i32
    return %arg0, %c0_i32 : i32, i32
  }
  func.func @transform_1(%arg0: i32) -> (i32, i32, i32) {
    %c0_i32 = arith.constant 0 : i32
    %c0_i32_0 = arith.constant 0 : i32
    %c0_i32_1 = arith.constant 0 : i32
    %c0_i32_2 = arith.constant 0 : i32
    return %c0_i32, %c0_i32_0, %c0_i32_1 : i32, i32, i32
  }
  func.func @transform_2(%arg0: i32) -> (i32, i32) {
    %c0_i32 = arith.constant 0 : i32
    %c0_i32_0 = arith.constant 0 : i32
    %c0_i32_1 = arith.constant 0 : i32
    return %c0_i32, %c0_i32_0 : i32, i32
  }
  func.func @transform_3(%arg0: i32) -> (i32, i32) {
    %c0_i32 = arith.constant 0 : i32
    %c0_i32_0 = arith.constant 0 : i32
    %c0_i32_1 = arith.constant 0 : i32
    return %c0_i32, %c0_i32_0 : i32, i32
  }
  func.func @transform_4(%arg0: i32) -> (i32, i32) {
    %c0_i32 = arith.constant 0 : i32
    %c0_i32_0 = arith.constant 0 : i32
    %c0_i32_1 = arith.constant 0 : i32
    return %c0_i32, %c0_i32_0 : i32, i32
  }
  func.func @transform_5(%arg0: i32) -> (i32, i32) {
    %c0_i32 = arith.constant 0 : i32
    %c0_i32_0 = arith.constant 0 : i32
    return %arg0, %c0_i32 : i32, i32
  }
}

</mosaic_0001>

<bundles_post_ra>
// kernel: tpu_custom_call.1
= control target key start
LH: loop header
LB: loop body
LE: loop exit
PB: predicated region body
PF: predicated region fallthrough
CT: control target
= control target key end

     0   :  { %10 = vsyncpa [#allocation3], 0  ;;  %s2191_s0 = inlined_call_operand.hbm [shape: f32[16,128], index: 0, kind: input, shape index: {}]   ;;  %s2192_s1 = inlined_call_operand.hbm [shape: f32[2,128,128], index: 1, kind: input, shape index: {}]   ;;  %s2193_s2 = inlined_call_operand.vmem [shape: f32[2,128], index: 2, kind: input, shape index: {}]   ;;  %s2194_s3 = inlined_call_operand.vmem [shape: f32[3,128], index: 3, kind: input, shape index: {}]   ;;  %s2195_s4 = inlined_call_operand.vmem [shape: f32[3,128], index: 4, kind: input, shape index: {}]   ;;  %s2196_s5 = inlined_call_operand.hbm [shape: f32[16,128], index: 5, kind: output, shape index: {}]  }
   0x1   :  { %12 = vsyncpa [#allocation3 + $0x1], 0 }
   0x2   :  { %13 = vsyncpa [#allocation6], 0 }
   0x3   :  { %14 = vsyncpa [#allocation4], 0 }
   0x4   :  { %16 = vsyncpa [#allocation4 + $0x1], 0  ;;  %s1832_s18 = smov 0   ;;  %s1834_s19 = smov 0  }
   0x5   :  { %s1836_s20 = smov 0   ;;  %s1838_s21 = smov 0  }
   0x6 LB: > { %s1853_s22 = sadd.s32 4294967295, %s1791_s21   ;;  %s1006_s23 = sadd.s32 4294967294, %s1791_s21   ;;  %s1791_s21 = sphi %s1838_s21, %s2216_s21   ;;  %s1787_s20 = sphi %s1836_s20, %s2215_s20   ;;  %s1783_s19 = sphi %s1834_s19, %s2214_s19   ;;  %s1779_s18 = sphi %s1832_s18, %s2213_s18  }
   0x7   : > { %p42_p0 = scmp.ne.s32.totalorder %s1783_s19, %s1779_s18  ;;  %p2197_p1 = scmp.eq.s32.totalorder %s1853_s22, 0 }
   0x8   : > { %p156_p3 = scmp.eq.s32.totalorder %s1006_s23, 1  ;;  %p1007_p5 = scmp.ge.s32.totalorder %s1791_s21, 1 }
   0x9   : > { %p1862_p4 = por %p2197_p1, %p42_p0  ;;  %p163_p7 = scmp.lt.s32.totalorder %s1791_s21, 3 }
   0xa   : > { %p1867_p6 = por %p156_p3, %p42_p0  ;;  %s1793_s27 = smov [#allocation5]  }
   0xb   : > { %s2200_s24 = scalar_select %p1862_p4, 1, 0 }
   0xc   : > { %s2201_s25 = scalar_select %p1867_p6, 1, 0 }
   0xd   : > { %p1872_p8 = pnand %p1007_p5, %p163_p7  ;;  %s175_s28 = sshll.u32 %s1793_s27, 4  ;;  %s1876_s28 = int_to_ptr.vmem [resolvable:$true] %s175_s28 }
   0xe   : > { %s1888_s30 = sadd.s32 1, %s1791_s21   ;;  %s29_s6 = sadd.s32 1, %s1787_s20 }
   0xf   : > { %s2202_s26 = scalar_select %p1872_p8, 1, 0 }
  0x10   : > { %p1596_p9 = pneg %p1872_p8  ;;  %s26_s7 = ssub.s32 %s1791_s21, %s1888_s30 }
  0x11   : > { %s1663_s10 = scalar_lea.hbm %s2192_s1, 4096 }
  0x12   : > { %p1883_p11 = pnand %p1596_p9, %p2197_p1  ;;  %p1664_p12 = scmp.ne.s32.totalorder %s2192_s1, %s1663_s10 }
  0x13   : > { %p1670_p5 = scmp.lt.u32.totalorder %s1663_s10, %s2192_s1 }
  0x14   : > { %p1665_p13 = pneg %p1883_p11 }
  0x16   : > { %p1666_p0 = pnand %p1665_p13, %p1664_p12 }
  0x18   : > { %p1667_p3 = pneg %p1666_p0 }
  0x1a   : > { %p1672_p7 = pnand %p1670_p5, %p1667_p3 }
  0x1c   : > { %1675 = shalt.err (!%p1672_p7)
}
  0x1d   : > { %s1676_s15 = scalar_lea.vmem %s1876_s28, 4096  ;;  %p1684_p2 = scmp.lt.s32.totalorder %s1876_s28, %s1876_s28 }
  0x1e   : > { %p1677_p9 = scmp.ne.s32.totalorder %s1876_s28, %s1676_s15  ;;  %p1685_p6 = scmp.lt.s32.totalorder %s1676_s15, %s1676_s15 }
  0x20   : > { %p1679_p10 = pnand %p1677_p9, %p1665_p13  ;;  %p1686_p4 = por %p1685_p6, %p1684_p2 }
  0x22   : > { %p1680_p1 = pneg %p1679_p10 }
  0x24   : > { %p1687_p8 = pnand %p1686_p4, %p1680_p1 }
  0x26   : > { %1690 = shalt.err (!%p1687_p8)
}
  0x27   : > { %s1794_s16 = smov 128   ;;  %s1795_s17 = smov 8  }
  0x28   : > { %1599 = dma.hbm_to_vmem [thread:$0]  (!%p1883_p11), %s2192_s1, 4096, %s1876_s28, [#allocation6], %s1794_s16, %s1794_s16, %s1795_s17  }
  0x29   : > { %p27_p2 = scmp.eq.s32.totalorder %s26_s7, 0  ;;  %p36_p1 = scmp.ne.s32.totalorder %s1787_s20, %s1783_s19 }
  0x2a   : > { %p37_p4 = scmp.eq.s32.totalorder %s1791_s21, 0  ;;  %p1609_p6 = scmp.lt.s32.totalorder %s1791_s21, 2 }
  0x2b   : > { %s1919_s8 = scalar_select %p27_p2, %s1787_s20, %s29_s6  }
  0x2c   : > { %p38_p8 = por %p37_p4, %p36_p1  ;;  %p2204_p10 = scmp.eq.s32.totalorder %s1853_s22, 1 }
  0x2d   : > { %s198_s10 = sand.u32 1, %s1787_s20   ;;  %s1011_s11 = sshll.u32 %s1791_s21, 7 }
  0x2e   : > { %p1923_p12 = por %p2204_p10, %p36_p1  ;;  %s1010_s12 = sshll.u32 %s198_s10, 3 }
  0x2f   : > { %s1932_s14 = scalar_lea.hbm %s2191_s0, %s1011_s11  ;;  %s202_s28 = scalar_lea.vmem [#allocation2], %s1010_s12 }
  0x30   : > { %s209_s6 = sshll.u32 %s202_s28, 4  ;;  %p1934_p11 = pnand %p1609_p6, %p38_p8  ;;  %s1938_s6 = int_to_ptr.vmem [resolvable:$true] %s209_s6 }
  0x31   : > { %s199_s15 = scalar_lea.sflag [#allocation3], %s198_s10  ;;  %s1691_s16 = scalar_lea.hbm %s1932_s14, 128 }
  0x32   : > { %p1692_p13 = scmp.ne.s32.totalorder %s1932_s14, %s1691_s16  ;;  %p1693_p0 = pneg %p1934_p11 }
  0x33   : > { %s1696_s27 = scalar_lea.hbm %s2191_s0, 256  ;;  %p1697_p7 = scmp.lt.u32.totalorder %s1932_s14, %s2191_s0 }
  0x34   : > { %p1694_p3 = pnand %p1693_p0, %p1692_p13  ;;  %p1698_p9 = scmp.lt.u32.totalorder %s1696_s27, %s1691_s16 }
  0x35   : > { %p1700_p1 = scmp.lt.u32.totalorder %s1691_s16, %s1932_s14 }
  0x36   : > { %p1695_p5 = pneg %p1694_p3  ;;  %p1699_p2 = por %p1698_p9, %p1697_p7 }
  0x38   : > { %p1701_p4 = por %p1700_p1, %p1699_p2 }
  0x3a   : > { %p1702_p6 = pnand %p1701_p4, %p1695_p5 }
  0x3c   : > { %1705 = shalt.err (!%p1702_p6)
}
  0x3d   : > { %s1706_s10 = scalar_lea.vmem %s1938_s6, 128  ;;  %s1796_s29 = smov [#allocation2]  }
  0x3e   : > { %p1707_p8 = scmp.ne.s32.totalorder %s1938_s6, %s1706_s10  ;;  %s1711_s13 = sshll.u32 %s1796_s29, 4  ;;  %s1712_s13 = int_to_ptr.vmem [resolvable:$false] %s1711_s13 }
  0x3f   : > { %s1713_s28 = scalar_lea.vmem %s1712_s13, 256  ;;  %p1714_p3 = scmp.lt.s32.totalorder %s1938_s6, %s1712_s13 }
  0x40   : > { %p1709_p10 = pnand %p1707_p8, %p1693_p0  ;;  %p1715_p7 = scmp.lt.s32.totalorder %s1713_s28, %s1706_s10 }
  0x42   : > { %p1710_p13 = pneg %p1709_p10  ;;  %p1716_p9 = por %p1715_p7, %p1714_p3 }
  0x44   : > { %p1717_p2 = pnand %p1716_p9, %p1710_p13 }
  0x46   : > { %1720 = shalt.err (!%p1717_p2)
}
  0x47   : > { %1603 = dma.hbm_to_vmem [thread:$0]  (!%p1934_p11), %s1932_s14, 128, %s1938_s6, %s199_s15  }
  0x48   : > { %p2207_p5 = scmp.ne.s32.totalorder %s2202_s26, 0 }
  0x49   : > { %s1968_s16 = sand.u32 (!%p2207_p5), 1, %s1783_s19   ;;  %p2208_p0 = scmp.ne.s32.totalorder (!%p2207_p5), %s2200_s24, 0 }
  0x4a   : > { %218 = sbr.rel (%p2207_p5) target bundleno = 1938 (0x792), region = 40  ;;  %s1013_s17 = sshll.u32 (!%p2207_p5), %s1968_s16, 3 }
  0x4b   : > { %s221_s23 = scalar_lea.sflag (!%p2207_p5), [#allocation3], %s1968_s16  ;;  %s1974_s27 = scalar_lea.vmem (!%p2207_p5), [#allocation2], %s1013_s17 }
  0x51   : > { %1766 = dma.done.wait (%p2208_p0), %s221_s23, 128  }
  0x52   : > { %1768 = vsyncadd (%p2208_p0), %s221_s23, 4294967168  ;;  %p2209_p11 = scmp.eq.s32.totalorder %s1853_s22, 0 }
  0x54   : > { %1770 = dma.done.wait (%p2209_p11), [#allocation6], 4096   ;;  %p2210_p1 = pmov %p2209_p11 }
  0x55   : > { %v1797_v0 = vmov 0.0|0.0   ;;  %vm1798_vm0 = vmmov 0   ;;  %v1799_v1 = vmov 0.0   ;;  %v1800_v2 = vmov 0.0078125|0.0078125   ;;  %v256_v3 = vld [vmem:[#allocation5] sm:$0xff] }
  0x56   : > { %1772 = vsyncadd (%p2210_p1), [#allocation6], 4294963200  ;;  %1444 = vmatprep.subr.bf16.mxu0 %v1797_v0  ;;  %1196 = vmatprep.mubr.msk.f32.mxu0 %vm1798_vm0, %v1799_v1  ;;  %v257_v4 = vld [vmem:[#allocation5 + $0x8] sm:$0xff]  ;;  %v258_v5 = vld [vmem:[#allocation5 + $0x10] sm:$0xff]  ;;  %s1025_s14 = sshll.u32 %s1853_s22, 7  ;;  %s254_s6 = scalar_lea.vmem [#allocation7], %s1013_s17 }
  0x57   : > { %1468 = vmatprep.subr.bf16.mxu1 %v1797_v0  ;;  %1231 = vmatprep.mubr.msk.f32.mxu1 %vm1798_vm0, %v1799_v1  ;;  %v1445_v6 = vpack.c.bf16 %v257_v4, %v256_v3  ;;  %v259_v7 = vld [vmem:[#allocation5 + $0x18] sm:$0xff]  ;;  %v260_v9 = vld [vmem:[#allocation5 + $0x20] sm:$0xff]  ;;  %v261_v10 = vld [vmem:[#allocation5 + $0x28] sm:$0xff]  ;;  %s926_s7 = sshll.u32 %s254_s6, 4  ;;  %s2147_s12 = scalar_lea.hbm %s2196_s5, %s1025_s14  ;;  %s2149_s7 = int_to_ptr.vmem [resolvable:$true] %s926_s7 }
  0x58   : > { %1469 = vmatpush3.bf16.msra.mxu1 %v1800_v2  ;;  %v1448_v8 = vpack.c.bf16 %v259_v7, %v258_v5  ;;  %v1451_v11 = vpack.c.bf16 %v261_v10, %v260_v9  ;;  %v262_v12 = vld [vmem:[#allocation5 + $0x30] sm:$0xff]  ;;  %v263_v13 = vld [vmem:[#allocation5 + $0x38] sm:$0xff]  ;;  %v264_v15 = vld [vmem:[#allocation5 + $0x40] sm:$0xff]  ;;  %s913_s10 = scalar_lea.sflag [#allocation4], %s1968_s16  ;;  %s1721_s29 = scalar_lea.vmem %s2149_s7, 128 }
  0x59   : > { %1470 = vmatprep.subr.bf16.mxu1 %v1797_v0  ;;  %1446 = vmatpush3.bf16.msra.mxu0 %v1445_v6  ;;  %v1454_v14 = vpack.c.bf16 %v263_v13, %v262_v12  ;;  %v265_v16 = vld [vmem:[#allocation5 + $0x48] sm:$0xff]  ;;  %v266_v18 = vld [vmem:[#allocation5 + $0x50] sm:$0xff]  ;;  %v267_v19 = vld [vmem:[#allocation5 + $0x58] sm:$0xff]  ;;  %p1722_p4 = scmp.ne.s32.totalorder %s2149_s7, %s1721_s29  ;;  %s1801_s22 = smov [#allocation7]  }
  0x5a   : > { %1447 = vmatprep.subr.bf16.mxu0 %v1797_v0  ;;  %v1457_v17 = vpack.c.bf16 %v265_v16, %v264_v15  ;;  %v1460_v20 = vpack.c.bf16 %v267_v19, %v266_v18  ;;  %v268_v21 = vld [vmem:[#allocation5 + $0x60] sm:$0xff]  ;;  %v269_v22 = vld [vmem:[#allocation5 + $0x68] sm:$0xff]  ;;  %v270_v24 = vld [vmem:[#allocation5 + $0x70] sm:$0xff]  ;;  %s1725_s17 = sshll.u32 %s1801_s22, 4  ;;  %s1726_s17 = int_to_ptr.vmem [resolvable:$false] %s1725_s17 }
  0x5b   : > { %v1463_v23 = vpack.c.bf16 %v269_v22, %v268_v21  ;;  %v271_v25 = vld [vmem:[#allocation5 + $0x78] sm:$0xff]  ;;  %v1016_v28 = vld [vmem:[%s2193_s2] ss:$0 sm:$0xff]  ;;  %v505_v33 = vld [vmem:[#allocation5 + $0x80] sm:$0xff]  ;;  %p1723_p6 = pnand %p1722_p4, %p1923_p12  ;;  %s1727_s13 = scalar_lea.vmem %s1726_s17, 256 }
  0x5c   : > { %1471 = vmatpush3.bf16.msra.mxu1 %v1800_v2  ;;  %v1466_v26 = vpack.c.bf16 %v271_v25, %v270_v24  ;;  %v2014_v27 = vld [vmem:[%s1974_s27] sm:$0xff]  ;;  %v506_v34 = vld [vmem:[#allocation5 + $0x88] sm:$0xff]  ;;  %v509_v39 = vld [vmem:[#allocation5 + $0xa0] sm:$0xff]  ;;  %p1728_p10 = scmp.lt.s32.totalorder %s2149_s7, %s1726_s17  ;;  %p1729_p13 = scmp.lt.s32.totalorder %s1727_s13, %s1721_s29 }
  0x5d   : > { %1472 = vmatprep.subr.bf16.mxu1 %v1797_v0  ;;  %1449 = vmatpush3.bf16.msra.mxu0 %v1448_v8  ;;  %v507_v35 = vld [vmem:[#allocation5 + $0x90] sm:$0xff]  ;;  %v1501_v36 = vpack.c.bf16 %v506_v34, %v505_v33  ;;  %v508_v37 = vld [vmem:[#allocation5 + $0x98] sm:$0xff]  ;;  %v510_v40 = vld [vmem:[#allocation5 + $0xa8] sm:$0xff]  ;;  %p1724_p8 = pneg %p1723_p6 }
  0x5e   : > { %1450 = vmatprep.subr.bf16.mxu0 %v1797_v0  ;;  %v1504_v38 = vpack.c.bf16 %v508_v37, %v507_v35  ;;  %v1507_v41 = vpack.c.bf16 %v510_v40, %v509_v39  ;;  %v511_v46 = vld [vmem:[#allocation5 + $0xb0] sm:$0xff]  ;;  %v512_v47 = vld [vmem:[#allocation5 + $0xb8] sm:$0xff]  ;;  %v513_v49 = vld [vmem:[#allocation5 + $0xc0] sm:$0xff]  ;;  %p1730_p3 = por %p1729_p13, %p1728_p10 }
  0x5f   : > { %v1510_v48 = vpack.c.bf16 %v512_v47, %v511_v46  ;;  %v514_v50 = vld [vmem:[#allocation5 + $0xc8] sm:$0xff]  ;;  %v515_v52 = vld [vmem:[#allocation5 + $0xd0] sm:$0xff]  ;;  %v516_v53 = vld [vmem:[#allocation5 + $0xd8] sm:$0xff] }
  0x60   : > { %1473 = vmatpush3.bf16.msra.mxu1 %v1800_v2  ;;  %v1513_v51 = vpack.c.bf16 %v514_v50, %v513_v49  ;;  %v1516_v54 = vpack.c.bf16 %v516_v53, %v515_v52  ;;  %v517_v55 = vld [vmem:[#allocation5 + $0xe0] sm:$0xff]  ;;  %v518_v56 = vld [vmem:[#allocation5 + $0xe8] sm:$0xff]  ;;  %v519_v58 = vld [vmem:[#allocation5 + $0xf0] sm:$0xff]  ;;  %p1731_p7 = pnand %p1730_p3, %p1724_p8 }
  0x61   : > { %1474 = vmatprep.subr.bf16.mxu1 %v1797_v0  ;;  %1452 = vmatpush3.bf16.msra.mxu0 %v1451_v11  ;;  %v1519_v57 = vpack.c.bf16 %v518_v56, %v517_v55  ;;  %v520_v59 = vld [vmem:[#allocation5 + $0xf8] sm:$0xff]  ;;  %v1017_v4 = vld [vmem:[%s2194_s3] ss:$0 sm:$0xff]  ;;  %v1019_v9 = vld [vmem:[%s2193_s2 + $0x1] ss:$0 sm:$0xff] }
  0x62   : > { %1453 = vmatprep.subr.bf16.mxu0 %v1797_v0  ;;  %v1522_v60 = vpack.c.bf16 %v520_v59, %v519_v58  ;;  %v1018_v6 = vld [vmem:[%s2195_s4] ss:$0 sm:$0xff]  ;;  %v1020_v21 = vld [vmem:[%s2194_s3 + $0x1] ss:$0 sm:$0xff] }
  0x64   : > { %1475 = vmatpush3.bf16.msra.mxu1 %v1800_v2 }
  0x65   : > { %1476 = vmatprep.subr.bf16.mxu1 %v1797_v0  ;;  %1455 = vmatpush3.bf16.msra.mxu0 %v1454_v14 }
  0x66   : > { %1456 = vmatprep.subr.bf16.mxu0 %v1797_v0 }
  0x68   : > { %1477 = vmatpush3.bf16.msra.mxu1 %v1800_v2 }
  0x69   : > { %1478 = vmatprep.subr.bf16.mxu1 %v1797_v0  ;;  %1458 = vmatpush3.bf16.msra.mxu0 %v1457_v17 }
  0x6a   : > { %1459 = vmatprep.subr.bf16.mxu0 %v1797_v0 }
  0x6c   : > { %1479 = vmatpush3.bf16.msra.mxu1 %v1800_v2 }
  0x6d   : > { %1480 = vmatprep.subr.bf16.mxu1 %v1797_v0  ;;  %1461 = vmatpush3.bf16.msra.mxu0 %v1460_v20 }
  0x6e   : > { %1462 = vmatprep.subr.bf16.mxu0 %v1797_v0 }
  0x70   : > { %1481 = vmatpush3.bf16.msra.mxu1 %v1800_v2 }
  0x71   : > { %1482 = vmatprep.subr.bf16.mxu1 %v1797_v0  ;;  %1464 = vmatpush3.bf16.msra.mxu0 %v1463_v23  ;;  %v1021_v23 = vld [vmem:[%s2195_s4 + $0x1] ss:$0 sm:$0xff] }
  0x72   : > { %1465 = vmatprep.subr.bf16.mxu0 %v1797_v0 }
  0x74   : > { %1483 = vmatpush3.bf16.msra.mxu1 %v1800_v2 }
  0x75   : > { %1500 = vmatprep.subr.bf16.mxu1 %v1797_v0  ;;  %1467 = vmatpush3.bf16.msra.mxu0 %v1466_v26 }
  0x76   : > { %1484 = vmatprep.subr.bf16.mxu0 %v1797_v0 }
  0x78   : > { %1197 = vmatmul.mubr.f32.vlgmr.msra.gmra.mrb[0].mxu0 %v2014_v27 }
  0x79   : > { %1485 = vmatpush3.bf16.msra.mxu0 %v1800_v2  ;;  %1266 = vmatprep.mubr.msk.f32.mxu0 %vm1798_vm0, %v1799_v1 }
  0x7a   : > { %1486 = vmatprep.subr.bf16.mxu0 %v1797_v0 }
  0x7d   : > { %1487 = vmatpush3.bf16.msra.mxu0 %v1800_v2 }
  0x7e   : > { %1488 = vmatprep.subr.bf16.mxu0 %v1797_v0 }
  0x81   : > { %1489 = vmatpush3.bf16.msra.mxu0 %v1800_v2 }
  0x82   : > { %1490 = vmatprep.subr.bf16.mxu0 %v1797_v0 }
  0x85   : > { %1491 = vmatpush3.bf16.msra.mxu0 %v1800_v2 }
  0x86   : > { %1492 = vmatprep.subr.bf16.mxu0 %v1797_v0 }
  0x89   : > { %1493 = vmatpush3.bf16.msra.mxu0 %v1800_v2 }
  0x8a   : > { %1494 = vmatprep.subr.bf16.mxu0 %v1797_v0 }
  0x8d   : > { %1495 = vmatpush3.bf16.msra.mxu0 %v1800_v2 }
  0x8e   : > { %1496 = vmatprep.subr.bf16.mxu0 %v1797_v0 }
  0x91   : > { %1497 = vmatpush3.bf16.msra.mxu0 %v1800_v2 }
  0x92   : > { %1498 = vmatprep.subr.bf16.mxu0 %v1797_v0 }
  0x95   : > { %1499 = vmatpush3.bf16.msra.mxu0 %v1800_v2 }
  0x96   : > { %1524 = vmatprep.subr.bf16.mxu0 %v1797_v0 }
 0x14b   : > { %v343_v29 = vpop.f32.mrb[0].mxu0 }
 0x14c   : > { %v344_v30 = vadd.f32 %v1016_v28, %v343_v29  ;;  %v1198_v31 = vpop.f32.mrb[1].mxu0 }
 0x14e   : > { %1651 = vtanh.f32 %v344_v30 }
 0x158   : > { %v1652_v32 = vpop.eup %1651 }
 0x159   : > { %1232 = vmatmul.mubr.f32.vlgmr.msra.gmra.mrb[0].mxu1 %v1652_v32 }
 0x15a   : > { %1301 = vmatprep.mubr.msk.f32.mxu1 %vm1798_vm0, %v1799_v1  ;;  %1502 = vmatpush3.bf16.msra.mxu1 %v1501_v36  ;;  %v1023_v36 = vld [vmem:[%s2195_s4 + $0x2] ss:$0 sm:$0xff] }
 0x15b   : > { %1503 = vmatprep.subr.bf16.mxu1 %v1797_v0 }
 0x15e   : > { %1505 = vmatpush3.bf16.msra.mxu1 %v1504_v38 }
 0x15f   : > { %1506 = vmatprep.subr.bf16.mxu1 %v1797_v0 }
 0x162   : > { %1508 = vmatpush3.bf16.msra.mxu1 %v1507_v41 }
 0x163   : > { %1509 = vmatprep.subr.bf16.mxu1 %v1797_v0 }
 0x166   : > { %1511 = vmatpush3.bf16.msra.mxu1 %v1510_v48 }
 0x167   : > { %1512 = vmatprep.subr.bf16.mxu1 %v1797_v0 }
 0x16a   : > { %1514 = vmatpush3.bf16.msra.mxu1 %v1513_v51 }
 0x16b   : > { %1515 = vmatprep.subr.bf16.mxu1 %v1797_v0 }
 0x16e   : > { %1517 = vmatpush3.bf16.msra.mxu1 %v1516_v54 }
 0x16f   : > { %1518 = vmatprep.subr.bf16.mxu1 %v1797_v0 }
 0x172   : > { %1520 = vmatpush3.bf16.msra.mxu1 %v1519_v57 }
 0x173   : > { %1521 = vmatprep.subr.bf16.mxu1 %v1797_v0 }
 0x176   : > { %1523 = vmatpush3.bf16.msra.mxu1 %v1522_v60 }
 0x177   : > { %1540 = vmatprep.subr.bf16.mxu1 %v1797_v0 }
 0x22c   : > { %v416_v42 = vpop.f32.mrb[0].mxu1 }
 0x22d   : > { %v420_v43 = vsub.f32 %v1652_v32, %v416_v42  ;;  %v1233_v44 = vpop.f32.mrb[1].mxu1 }
 0x22f   : > { %v421_v45 = vmul.f32 %v420_v43, %v420_v43 }
 0x231   : > { %1267 = vmatmul.mubr.f32.vlgmr.msra.gmra.mrb[2].mxu0 %v421_v45 }
 0x232   : > { %1525 = vmatpush3.bf16.msra.mxu0 %v1800_v2  ;;  %1336 = vmatprep.mubr.msk.f32.mxu0 %vm1798_vm0, %v1799_v1 }
 0x233   : > { %1526 = vmatprep.subr.bf16.mxu0 %v1797_v0 }
 0x236   : > { %1527 = vmatpush3.bf16.msra.mxu0 %v1800_v2 }
 0x237   : > { %1528 = vmatprep.subr.bf16.mxu0 %v1797_v0 }
 0x23a   : > { %1529 = vmatpush3.bf16.msra.mxu0 %v1800_v2 }
 0x23b   : > { %1530 = vmatprep.subr.bf16.mxu0 %v1797_v0 }
 0x23e   : > { %1531 = vmatpush3.bf16.msra.mxu0 %v1800_v2 }
 0x23f   : > { %1532 = vmatprep.subr.bf16.mxu0 %v1797_v0 }
 0x242   : > { %1533 = vmatpush3.bf16.msra.mxu0 %v1800_v2 }
 0x243   : > { %1534 = vmatprep.subr.bf16.mxu0 %v1797_v0 }
 0x246   : > { %1535 = vmatpush3.bf16.msra.mxu0 %v1800_v2 }
 0x247   : > { %1536 = vmatprep.subr.bf16.mxu0 %v1797_v0 }
 0x24a   : > { %1537 = vmatpush3.bf16.msra.mxu0 %v1800_v2 }
 0x24b   : > { %1538 = vmatprep.subr.bf16.mxu0 %v1797_v0 }
 0x24e   : > { %1539 = vmatpush3.bf16.msra.mxu0 %v1800_v2 }
 0x24f   : > { %1556 = vmatprep.subr.bf16.mxu0 %v1797_v0 }
 0x304   : > { %v488_v61 = vpop.f32.mrb[2].mxu0 }
 0x305   : > { %v489_v62 = vadd.f32 1e-05, %v488_v61  ;;  %v1268_v63 = vpop.f32.mrb[3].mxu0 }
 0x307   : > { %1653 = vrsqrt.f32 %v489_v62 }
 0x311   : > { %v1654_v3 = vpop.eup %1653 }
 0x312   : > { %v493_v5 = vmul.f32 %v1654_v3, %v420_v43 }
 0x314   : > { %v498_v7 = vmul.f32 %v1017_v4, %v493_v5 }
 0x316   : > { %v503_v8 = vadd.f32 %v1018_v6, %v498_v7 }
 0x318   : > { %1302 = vmatmul.mubr.f32.vlgmr.msra.gmra.mrb[2].mxu1 %v503_v8 }
 0x319   : > { %1541 = vmatpush3.bf16.msra.mxu1 %v1800_v2  ;;  %1371 = vmatprep.mubr.msk.f32.mxu1 %vm1798_vm0, %v1799_v1 }
 0x31a   : > { %1542 = vmatprep.subr.bf16.mxu1 %v1797_v0 }
 0x31d   : > { %1543 = vmatpush3.bf16.msra.mxu1 %v1800_v2 }
 0x31e   : > { %1544 = vmatprep.subr.bf16.mxu1 %v1797_v0 }
 0x321   : > { %1545 = vmatpush3.bf16.msra.mxu1 %v1800_v2 }
 0x322   : > { %1546 = vmatprep.subr.bf16.mxu1 %v1797_v0 }
 0x325   : > { %1547 = vmatpush3.bf16.msra.mxu1 %v1800_v2 }
 0x326   : > { %1548 = vmatprep.subr.bf16.mxu1 %v1797_v0 }
 0x329   : > { %1549 = vmatpush3.bf16.msra.mxu1 %v1800_v2 }
 0x32a   : > { %1550 = vmatprep.subr.bf16.mxu1 %v1797_v0 }
 0x32d   : > { %1551 = vmatpush3.bf16.msra.mxu1 %v1800_v2 }
 0x32e   : > { %1552 = vmatprep.subr.bf16.mxu1 %v1797_v0 }
 0x331   : > { %1553 = vmatpush3.bf16.msra.mxu1 %v1800_v2 }
 0x332   : > { %1554 = vmatprep.subr.bf16.mxu1 %v1797_v0 }
 0x335   : > { %1555 = vmatpush3.bf16.msra.mxu1 %v1800_v2 }
 0x336   : > { %1572 = vmatprep.subr.bf16.mxu1 %v1797_v0 }
 0x3eb   : > { %v592_v10 = vpop.f32.mrb[2].mxu1 }
 0x3ec   : > { %v593_v11 = vadd.f32 %v1019_v9, %v592_v10  ;;  %v1303_v12 = vpop.f32.mrb[3].mxu1 }
 0x3ee   : > { %1655 = vtanh.f32 %v593_v11 }
 0x3f8   : > { %v1656_v13 = vpop.eup %1655 }
 0x3f9   : > { %1337 = vmatmul.mubr.f32.vlgmr.msra.gmra.mrb[4].mxu0 %v1656_v13 }
 0x3fa   : > { %1557 = vmatpush3.bf16.msra.mxu0 %v1800_v2  ;;  %1406 = vmatprep.mubr.msk.f32.mxu0 %vm1798_vm0, %v1799_v1 }
 0x3fb   : > { %1558 = vmatprep.subr.bf16.mxu0 %v1797_v0 }
 0x3fe   : > { %1559 = vmatpush3.bf16.msra.mxu0 %v1800_v2 }
 0x3ff   : > { %1560 = vmatprep.subr.bf16.mxu0 %v1797_v0 }
 0x402   : > { %1561 = vmatpush3.bf16.msra.mxu0 %v1800_v2 }
 0x403   : > { %1562 = vmatprep.subr.bf16.mxu0 %v1797_v0 }
 0x406   : > { %1563 = vmatpush3.bf16.msra.mxu0 %v1800_v2 }
 0x407   : > { %1564 = vmatprep.subr.bf16.mxu0 %v1797_v0 }
 0x40a   : > { %1565 = vmatpush3.bf16.msra.mxu0 %v1800_v2 }
 0x40b   : > { %1566 = vmatprep.subr.bf16.mxu0 %v1797_v0 }
 0x40e   : > { %1567 = vmatpush3.bf16.msra.mxu0 %v1800_v2 }
 0x40f   : > { %1568 = vmatprep.subr.bf16.mxu0 %v1797_v0 }
 0x412   : > { %1569 = vmatpush3.bf16.msra.mxu0 %v1800_v2 }
 0x413   : > { %1570 = vmatprep.subr.bf16.mxu0 %v1797_v0 }
 0x416   : > { %1571 = vmatpush3.bf16.msra.mxu0 %v1800_v2 }
 0x4cc   : > { %v665_v14 = vpop.f32.mrb[4].mxu0 }
 0x4cd   : > { %v669_v15 = vsub.f32 %v1656_v13, %v665_v14  ;;  %v1338_v16 = vpop.f32.mrb[5].mxu0 }
 0x4cf   : > { %v670_v17 = vmul.f32 %v669_v15, %v669_v15 }
 0x4d1   : > { %1372 = vmatmul.mubr.f32.vlgmr.msra.gmra.mrb[4].mxu1 %v670_v17 }
 0x4d2   : > { %1573 = vmatpush3.bf16.msra.mxu1 %v1800_v2  ;;  %1441 = vmatprep.mubr.msk.f32.mxu1 %vm1798_vm0, %v1799_v1 }
 0x4d3   : > { %1574 = vmatprep.subr.bf16.mxu1 %v1797_v0 }
 0x4d6   : > { %1575 = vmatpush3.bf16.msra.mxu1 %v1800_v2 }
 0x4d7   : > { %1576 = vmatprep.subr.bf16.mxu1 %v1797_v0 }
 0x4da   : > { %1577 = vmatpush3.bf16.msra.mxu1 %v1800_v2 }
 0x4db   : > { %1578 = vmatprep.subr.bf16.mxu1 %v1797_v0 }
 0x4de   : > { %1579 = vmatpush3.bf16.msra.mxu1 %v1800_v2 }
 0x4df   : > { %1580 = vmatprep.subr.bf16.mxu1 %v1797_v0 }
 0x4e2   : > { %1581 = vmatpush3.bf16.msra.mxu1 %v1800_v2 }
 0x4e3   : > { %1582 = vmatprep.subr.bf16.mxu1 %v1797_v0 }
 0x4e6   : > { %1583 = vmatpush3.bf16.msra.mxu1 %v1800_v2 }
 0x4e7   : > { %1584 = vmatprep.subr.bf16.mxu1 %v1797_v0 }
 0x4ea   : > { %1585 = vmatpush3.bf16.msra.mxu1 %v1800_v2 }
 0x4eb   : > { %1586 = vmatprep.subr.bf16.mxu1 %v1797_v0 }
 0x4ee   : > { %1587 = vmatpush3.bf16.msra.mxu1 %v1800_v2 }
 0x5a4   : > { %v737_v1 = vpop.f32.mrb[4].mxu1 }
 0x5a5   : > { %v738_v18 = vadd.f32 1e-05, %v737_v1  ;;  %v1373_v19 = vpop.f32.mrb[5].mxu1 }
 0x5a7   : > { %1657 = vrsqrt.f32 %v738_v18 }
 0x5b1   : > { %v1658_v20 = vpop.eup %1657 }
 0x5b2   : > { %v742_v22 = vmul.f32 %v1658_v20, %v669_v15 }
 0x5b4   : > { %v747_v24 = vmul.f32 %v1020_v21, %v742_v22 }
 0x5b6   : > { %v752_v25 = vadd.f32 %v1021_v23, %v747_v24 }
 0x5b8   : > { %v753_v0 = vadd.f32 %v752_v25, %v2014_v27  ;;  %v1022_v27 = vld [vmem:[%s2194_s3 + $0x2] ss:$0 sm:$0xff] }
 0x5ba   : > { %1659 = vtanh.f32 %v753_v0 }
 0x5c4   : > { %v1660_v2 = vpop.eup %1659 }
 0x5c5   : > { %1407 = vmatmul.mubr.f32.vlgmr.msra.gmra.mrb[6].mxu0 %v1660_v2 }
 0x698   : > { %v823_v26 = vpop.f32.mrb[6].mxu0 }
 0x699   : > { %v827_v28 = vsub.f32 %v1660_v2, %v823_v26  ;;  %v1408_v29 = vpop.f32.mrb[7].mxu0 }
 0x69b   : > { %v828_v30 = vmul.f32 %v827_v28, %v827_v28 }
 0x69d   : > { %1442 = vmatmul.mubr.f32.vlgmr.msra.gmra.mrb[6].mxu1 %v828_v30 }
 0x770   : > { %v895_v31 = vpop.f32.mrb[6].mxu1 }
 0x771   : > { %v896_v32 = vadd.f32 1e-05, %v895_v31  ;;  %v1443_v33 = vpop.f32.mrb[7].mxu1 }
 0x773   : > { %1661 = vrsqrt.f32 %v896_v32 }
 0x77d   : > { %v1662_v34 = vpop.eup %1661 }
 0x77e   : > { %v900_v35 = vmul.f32 %v1662_v34, %v827_v28 }
 0x780   : > { %v905_v37 = vmul.f32 %v1022_v27, %v900_v35 }
 0x782   : > { %v910_v38 = vadd.f32 %v1023_v36, %v905_v37 }
 0x784   : > { %911 = vst [vmem:[%s254_s6] sm:$0xff] %v910_v38 }
 0x785   : > { %1734 = shalt.err (!%p1731_p7)
}
 0x786   : > { %s1735_s16 = scalar_lea.hbm %s2147_s12, 128  ;;  %s1739_s27 = scalar_lea.hbm %s2196_s5, 256 }
 0x787   : > { %p1736_p9 = scmp.ne.s32.totalorder %s2147_s12, %s1735_s16  ;;  %p1740_p0 = scmp.lt.u32.totalorder %s2147_s12, %s2196_s5 }
 0x788   : > { %p1741_p11 = scmp.lt.u32.totalorder %s1739_s27, %s1735_s16  ;;  %p1743_p4 = scmp.lt.u32.totalorder %s1735_s16, %s2147_s12 }
 0x789   : > { %p1737_p2 = pnand %p1736_p9, %p1923_p12 }
 0x78a   : > { %p1742_p1 = por %p1741_p11, %p1740_p0 }
 0x78b   : > { %p1738_p5 = pneg %p1737_p2 }
 0x78c   : > { %p1744_p6 = por %p1743_p4, %p1742_p1 }
 0x78e   : > { %p1745_p8 = pnand %p1744_p6, %p1738_p5 }
 0x790   : > { %1748 = shalt.err (!%p1745_p8)
}
 0x791   : > { %1594 = dma.vmem_to_hbm [thread:$0]  (%p1923_p12), %s2149_s7, 128, %s2147_s12, %s913_s10  }
 0x792 PF: > { %s938_s14 = sand.u32 1, %s1779_s18   ;;  %p2211_p10 = scmp.ne.s32.totalorder %s2201_s25, 0 }
 0x793   : > { %p2212_p13 = scmp.ge.s32.totalorder %s1791_s21, 2  ;;  %s939_s6 = scalar_lea.sflag [#allocation4], %s938_s14 }
 0x795   : > { %p1605_p3 = pnand %p2212_p13, %p2211_p10 }
 0x797   : > { %1774 = dma.done.wait (!%p1605_p3), %s939_s6, 128  }
 0x798   : > { %1776 = vsyncadd (!%p1605_p3), %s939_s6, 4294967168  ;;  %p19_p7 = scmp.ge.s32.totalorder %s1888_s30, 4   ;;  %s2213_s18 = smov %s1783_s19 }
 0x799   : > { %s2214_s19 = smov %s1787_s20  ;;  %s2215_s20 = smov %s1919_s8 }
 0x79a   : > { %s2216_s21 = smov %s1888_s30  ;;  %21 = sbr.rel (!%p19_p7) target bundleno = 6 (0x6), region = 90 }
 0x7a1   :  { %944 = vsyncpa [#allocation3], 1 }
 0x7a2   :  { %946 = vsyncpa [#allocation3 + $0x1], 1 }
 0x7a3   :  { %947 = vsyncpa [#allocation6], 1 }
 0x7a4   :  { %948 = vsyncpa [#allocation4], 1 }
 0x7a5   :  { %950 = vsyncpa [#allocation4 + $0x1], 1 }

</bundles_post_ra>
